<compile_context>
chip_gen: v7x
topology: tpu7x:2x2x1
jax: 0.10.0
libtpu: 0.0.40
codegen_flags: <defaults>
</compile_context>

<pallas_src>
import functools

import jax
import jax.numpy as jnp
from jax import lax
from jax.experimental import pallas as pl
from jax.experimental.pallas import tpu as pltpu

# Hyperparameters of the module (kwargs a1, a2). The PyTorch defaults (False)
# degenerate to a constant output, so we pick deterministic non-trivial values.
A1 = 2.0
A2 = 1.0

SUBLANES = 8
LANES = 128
MAX_WIDTH = 8192                       # widest lane-slab we consider
TARGET_BLOCK_BYTES = 2 * 1024 * 1024   # ~2 MiB per block


def _squash_kernel(x_ref, o_ref, *, a1, a2):
    x = x_ref[...].astype(jnp.float32)
    if a1 == 2.0:
        p = x * x                              # |x|**2 == x*x, no abs needed
    elif float(a1) == int(a1):
        p = lax.integer_pow(jnp.abs(x), int(a1))
    else:
        p = jnp.abs(x) ** a1                   # general (non-integer) exponent
    o_ref[...] = (p * pl.reciprocal(p + a2, approx=False)).astype(o_ref.dtype)


def _choose_width(n):
    """Widest multiple of 128 (<= MAX_WIDTH) that evenly divides n.

    Returns None when n is not a multiple of 128 (caller pads the tail)."""
    if n % LANES != 0:
        return None
    best = LANES
    w = MAX_WIDTH
    while w >= LANES:
        if n % w == 0:
            best = w
            break
        w -= LANES
    return best


def squash_default(x, a1=A1, a2=A2):
    """Elementwise squash: |x|**a1 / (|x|**a1 + a2). Preserves shape/dtype."""
    orig_shape = x.shape
    orig_dtype = x.dtype

    flat = x.reshape(-1)
    n = flat.shape[0]

    w = _choose_width(n)
    pad = 0
    if w is None:
        # Rare fallback (n not a multiple of 128): pad only the small tail.
        w = LANES
        pad = (-n) % w
        flat = jnp.pad(flat, (0, pad))
    rows = flat.shape[0] // w
    x2d = flat.reshape(rows, w)

    # Pick ~2 MiB blocks: block_rows * w * itemsize bytes, multiple of 8 rows.
    itemsize = jnp.dtype(orig_dtype).itemsize
    block_rows = max(1, TARGET_BLOCK_BYTES // (w * itemsize))
    block_rows = max(SUBLANES, (block_rows // SUBLANES) * SUBLANES)
    if block_rows >= rows:
        block_rows = rows  # full-extent block along rows is always legal

    grid = (pl.cdiv(rows, block_rows),)

    out2d = pl.pallas_call(
        functools.partial(_squash_kernel, a1=a1, a2=a2),
        out_shape=jax.ShapeDtypeStruct((rows, w), orig_dtype),
        grid_spec=pltpu.PrefetchScalarGridSpec(
            num_scalar_prefetch=0,
            grid=grid,
            in_specs=[pl.BlockSpec((block_rows, w), lambda i: (i, 0))],
            out_specs=pl.BlockSpec((block_rows, w), lambda i: (i, 0)),
        ),
        compiler_params=pltpu.CompilerParams(
            dimension_semantics=("parallel",),
        ),
    )(x2d)

    out_flat = out2d.reshape(-1)
    if pad:
        out_flat = out_flat[:n]
    return out_flat.reshape(orig_shape)


def _reference(x, a1=A1, a2=A2):
    p = jnp.abs(x).astype(jnp.float32) ** a1
    return (p / (p + a2)).astype(x.dtype)


if __name__ == "__main__":
    key = jax.random.PRNGKey(0)
    # Small NCHW-shaped input consistent with a capsule-net feature map.
    x = jax.random.normal(key, (2, 4, 16, 16), dtype=jnp.float32)

    out = squash_default(x)
    out = jax.block_until_ready(out)

    ref = _reference(x)
    assert out.shape == x.shape
    assert out.dtype == x.dtype
    assert jnp.allclose(out, ref, atol=1e-6, rtol=1e-5), "mismatch vs reference"

    print("KERNEL_OK")
</pallas_src>

<mosaic_0001>
module attributes {stable_mosaic.version = 11 : i64} {
  func.func @_squash_kernel(%arg0: i32, %arg1: memref<1x2048xf32, #tpu.memory_space<vmem>>, %arg2: memref<1x2048xf32, #tpu.memory_space<vmem>>) attributes {dimension_semantics = [#tpu.dimension_semantics<parallel>], iteration_bounds = array<i64: 1>, scalar_prefetch = 0 : i64, scratch_operands = 0 : i64, tpu.core_type = #tpu.core_type<tc>, window_params = [{transform_indices = @transform_0, window_bounds = array<i64: 1, 2048>}, {transform_indices = @transform_1, window_bounds = array<i64: 1, 2048>}]} {
    %c0 = arith.constant 0 : index
    %c0_0 = arith.constant 0 : index
    %0 = vector.load %arg1[%c0, %c0_0] : memref<1x2048xf32, #tpu.memory_space<vmem>>, vector<1x2048xf32>
    %1 = arith.mulf %0, %0 : vector<1x2048xf32>
    %cst = arith.constant 1.000000e+00 : f32
    %2 = vector.broadcast %cst : f32 to vector<1x2048xf32>
    %3 = arith.addf %1, %2 : vector<1x2048xf32>
    %4 = tpu.reciprocal %3 : vector<1x2048xf32> -> vector<1x2048xf32>
    %5 = arith.mulf %1, %4 : vector<1x2048xf32>
    %c0_1 = arith.constant 0 : index
    %c0_2 = arith.constant 0 : index
    %6 = vector.load %arg2[%c0_1, %c0_2] : memref<1x2048xf32, #tpu.memory_space<vmem>>, vector<1x2048xf32>
    tpu.vector_store %arg2[%c0_1, %c0_2], %5 {strides = array<i32>} : memref<1x2048xf32, #tpu.memory_space<vmem>>, vector<1x2048xf32>,
    return
  }
  func.func @transform_0(%arg0: i32) -> (i32, i32) {
    %c0_i32 = arith.constant 0 : i32
    %c0_i32_0 = arith.constant 0 : i32
    return %arg0, %c0_i32 : i32, i32
  }
  func.func @transform_1(%arg0: i32) -> (i32, i32) {
    %c0_i32 = arith.constant 0 : i32
    %c0_i32_0 = arith.constant 0 : i32
    return %arg0, %c0_i32 : i32, i32
  }
}

</mosaic_0001>

<bundles_post_ra>
// kernel: tpu_custom_call.1
= control target key start
LH: loop header
LB: loop body
LE: loop exit
PB: predicated region body
PF: predicated region fallthrough
CT: control target
= control target key end

     0   :  { %6 = vsyncpa [#allocation3], 0  ;;  %s138_s0 = inlined_call_operand.hbm [shape: f32[1,2048], index: 0, kind: input, shape index: {}]   ;;  %s139_s1 = inlined_call_operand.hbm [shape: f32[1,2048], index: 1, kind: output, shape index: {}]  }
   0x1   :  { %7 = vsyncpa [#allocation4], 0  ;;  %s102_s6 = smov [#allocation2]   ;;  %s54_s10 = scalar_lea.hbm %s138_s0, 256 }
   0x2   :  { %s14_s7 = sshll.u32 %s102_s6, 4  ;;  %p55_p0 = scmp.ne.s32.totalorder %s138_s0, %s54_s10  ;;  %s15_s7 = int_to_ptr.vmem [resolvable:$true] %s14_s7 }
   0x3   :  { %p58_p1 = scmp.lt.u32.totalorder %s54_s10, %s138_s0 }
   0x5   :  { %p60_p2 = pnand %p58_p1, %p55_p0 }
   0x7   :  { %63 = shalt.err (!%p60_p2)
}
   0x8   :  { %s64_s15 = scalar_lea.vmem %s15_s7, 256  ;;  %p69_p4 = scmp.lt.s32.totalorder %s15_s7, %s15_s7 }
   0x9   :  { %p65_p3 = scmp.ne.s32.totalorder %s15_s7, %s64_s15  ;;  %p70_p5 = scmp.lt.s32.totalorder %s64_s15, %s64_s15 }
   0xb   :  { %p71_p6 = por %p70_p5, %p69_p4 }
   0xd   :  { %p72_p7 = pnand %p71_p6, %p65_p3 }
   0xf   :  { %75 = shalt.err (!%p72_p7)
}
  0x10   :  { %17 = dma.hbm_to_vmem [thread:$0]  %s138_s0, 256, %s15_s7, [#allocation3]  }
  0x11   :  { %98 = dma.done.wait [#allocation3], 256  }
  0x12   :  { %99 = vsyncadd [#allocation3], 4294967040  ;;  %v21_v0 = vld [vmem:[#allocation2] sm:$0xff]  ;;  %v22_v1 = vld [vmem:[#allocation2 + $0x8] sm:$0xff]  ;;  %s103_s18 = smov [#allocation5]  }
  0x13   :  { %v23_v2 = vmul.f32 %v21_v0, %v21_v0  ;;  %v24_v3 = vmul.f32 %v22_v1, %v22_v1  ;;  %s39_s19 = sshll.u32 %s103_s18, 4  ;;  %s40_s19 = int_to_ptr.vmem [resolvable:$true] %s39_s19 }
  0x14   :  { %s76_s0 = scalar_lea.vmem %s40_s19, 256  ;;  %p81_p9 = scmp.lt.s32.totalorder %s40_s19, %s40_s19 }
  0x15   :  { %v25_v4 = vadd.f32 1.0, %v23_v2  ;;  %v26_v5 = vadd.f32 1.0, %v24_v3  ;;  %p77_p8 = scmp.ne.s32.totalorder %s40_s19, %s76_s0  ;;  %p82_p10 = scmp.lt.s32.totalorder %s76_s0, %s76_s0 }
  0x17   :  { %50 = vrcp.f32 %v25_v4  ;;  %p83_p11 = por %p82_p10, %p81_p9 }
  0x18   :  { %52 = vrcp.f32 %v26_v5 }
  0x19   :  { %p84_p12 = pnand %p83_p11, %p77_p8 }
  0x21   :  { %v51_v6 = vpop.eup %50 }
  0x22   :  { %v53_v7 = vpop.eup %52  ;;  %v29_v8 = vmul.f32 %v51_v6, %v23_v2 }
  0x23   :  { %v30_v9 = vmul.f32 %v53_v7, %v24_v3 }
  0x24   :  { %31 = vst [vmem:[#allocation5] sm:$0xff] %v29_v8 }
  0x25   :  { %32 = vst [vmem:[#allocation5 + $0x8] sm:$0xff] %v30_v9 }
  0x26   :  { %87 = shalt.err (!%p84_p12)
}
  0x27   :  { %s88_s22 = scalar_lea.hbm %s139_s1, 256 }
  0x28   :  { %p89_p13 = scmp.ne.s32.totalorder %s139_s1, %s88_s22  ;;  %p92_p0 = scmp.lt.u32.totalorder %s88_s22, %s139_s1 }
  0x2a   :  { %p94_p1 = pnand %p92_p0, %p89_p13 }
  0x2c   :  { %97 = shalt.err (!%p94_p1)
}
  0x2d   :  { %42 = dma.vmem_to_hbm [thread:$0]  %s40_s19, 256, %s139_s1, [#allocation4]  }
  0x2e   :  { %100 = dma.done.wait [#allocation4], 256  }
  0x2f   :  { %101 = vsyncadd [#allocation4], 4294967040 }
  0x30   :  { %46 = vsyncpa [#allocation3], 1 }
  0x31   :  { %47 = vsyncpa [#allocation4], 1 }

</bundles_post_ra>
